<compile_context>
chip_gen: v5e
topology: v5e:2x2
jax: 0.10.0
libtpu: 0.0.40
codegen_flags: <defaults>
</compile_context>

<pallas_src>
import functools

import jax
import jax.numpy as jnp
from jax.experimental import pallas as pl
from jax.experimental.pallas import tpu as pltpu

_LANE = 128      # fp32 lane quantum (last dim)
_SUBLANE = 8     # fp32 sublane quantum (second-to-last dim)


# ----------------------------- hardware helpers -----------------------------

def _vmem_capacity_bytes():
    try:
        cap = int(getattr(pltpu.get_tpu_info(), "vmem_capacity_bytes", 0))
        if cap > 0:
            return cap
    except Exception:
        pass
    return 64 << 20  # conservative default = v7x per-TensorCore VMEM


def _default_budget(cap):
    # ~40 MiB on v7x (64 MiB VMEM/TC), ~80 MiB on v5e/v6e (128 MiB/TC).
    return max(24 << 20, min(int(cap * 0.65), cap - (16 << 20)))


def _vmem_limit(need_bytes, cap):
    req = int(need_bytes * 1.25) + (2 << 20)
    return int(max(16 << 20, min(req, cap - (16 << 20))))


# ----------------------------- tiling helpers --------------------------------

def _divisors(n):
    out, d = set(), 1
    while d * d <= n:
        if n % d == 0:
            out.add(d)
            out.add(n // d)
        d += 1
    return sorted(out)


def _pick_tile(dim, quantum, max_elems):
    """Largest multiple of `quantum` dividing `dim` that is <= max_elems; falls
    back to the full dim (always a legal block) if nothing aligned fits."""
    if dim <= max_elems:
        return dim
    t = (max_elems // quantum) * quantum
    while t >= quantum:
        if dim % t == 0:
            return t
        t -= quantum
    return dim


# ------------------------------- kernels -------------------------------------

def _fused_kernel(x_ref, w1t_ref, b1_ref, w2t_ref, b2_ref, o_ref, *, inv_l, tb, C):
    """Single-pass SE on a resident (tb*C, L) slab: squeeze + excitation + scale.

    x is flattened to (B*C, L); each grid step owns `tb` whole batch rows.  The
    gate is computed per batch row in column orientation so it lands with C on
    sublanes and broadcasts directly over the lane-dense (C, L) tile (fp32 only
    for the tiny per-channel math; the big multiply stays in the input dtype)."""
    for i in range(tb):                       # static unroll; tb is capped small
        rows = slice(i * C, (i + 1) * C)
        xi = x_ref[rows, :]                                              # (C, L)
        # squeeze: mean over L with fp32 accumulation (lane reduce)
        yi = jnp.sum(xi, axis=-1, keepdims=True, dtype=jnp.float32) * inv_l   # (C, 1)
        # excitation: two tiny column-oriented matvecs
        hi = jnp.maximum(
            jnp.dot(w1t_ref[...], yi, preferred_element_type=jnp.float32) + b1_ref[...],
            0.0)                                                         # (H, 1)
        zi = jnp.dot(w2t_ref[...], hi, preferred_element_type=jnp.float32) + b2_ref[...]
        si = 1.0 / (1.0 + jnp.exp(-zi))                                  # (C, 1) exact sigmoid
        # scale: gate cast once; multiply + store in the input dtype
        o_ref[rows, :] = (xi * si.astype(xi.dtype)).astype(o_ref.dtype)


def _gate_kernel(x_ref, w1_ref, b1_ref, w2_ref, b2_ref, s_ref, acc_ref, *, inv_l):
    """Fallback stage 1: mean over L accumulated across L-tiles, excitation once."""
    l = pl.program_id(1)

    @pl.when(l == 0)
    def _init():
        acc_ref[...] = jnp.zeros_like(acc_ref)

    # fp32 accumulation without an explicit whole-tile up-cast
    acc_ref[...] += jnp.sum(x_ref[...], axis=-1, dtype=jnp.float32)

    @pl.when(l == pl.num_programs(1) - 1)
    def _finalize():
        y = acc_ref[...] * inv_l                                          # (tb, C) mean
        h = jnp.maximum(
            jnp.dot(y, w1_ref[...], preferred_element_type=jnp.float32) + b1_ref[...], 0.0)
        z = jnp.dot(h, w2_ref[...], preferred_element_type=jnp.float32) + b2_ref[...]
        s_ref[...] = (1.0 / (1.0 + jnp.exp(-z))).astype(s_ref.dtype)


def _scale_kernel(x_ref, s_ref, o_ref):
    """Fallback stage 2: lane-dense channel-wise rescale in the input dtype."""
    o_ref[...] = (x_ref[...] * s_ref[...].astype(x_ref.dtype)).astype(o_ref.dtype)


# ------------------------------- wrapper -------------------------------------

def se_layer(x, w1, b1, w2, b2, *, vmem_budget_bytes=None, donate_x=False):
    """x: (B, C, L). w1: (C, H) (transposed vs. torch Linear), b1: (H,),
    w2: (H, C), b2: (C,). Returns x * sigmoid(fc2(relu(fc1(mean_L(x)))))."""
    B, C, L = x.shape
    H = w1.shape[1]
    itemsize = jnp.dtype(x.dtype).itemsize
    cap = _vmem_capacity_bytes()
    if vmem_budget_bytes is None:
        vmem_budget_bytes = _default_budget(cap)
    params_bytes = (C * H + H + H * C + C) * 4
    target = 6 << 20           # per-block byte target (amortizes per-step overhead)

    R = B * C
    x2 = x.reshape(R, L)       # free bitcast; full L stays lane-dense

    # ------------------ fused single-pass path (preferred) -------------------
    max_unroll = 64            # bound on the static per-row loop in the kernel
    row_bytes = C * L * itemsize
    fused_extra = C * L * (itemsize + 4) + params_bytes + 4096   # per-row fp32 temps
    cands = [d for d in _divisors(B)
             if d <= max_unroll and (d == B or (d * C) % _SUBLANE == 0)]
    fitting = [d for d in cands
               if 4 * d * row_bytes + fused_extra <= vmem_budget_bytes]
    if fitting:
        good = [d for d in fitting if d * row_bytes >= target]
        if good:
            tb = min(good)                 # hit the byte target, keep the grid long
        else:
            two = [d for d in fitting if B // d >= 2 and d * row_bytes >= (1 << 20)]
            tb = max(two) if two else max(fitting)
        tbc = tb * C
        nb = B // tb
        blk = tbc * L * itemsize

        w1t = jnp.transpose(w1).astype(jnp.float32)        # (H, C)
        w2t = jnp.transpose(w2).astype(jnp.float32)        # (C, H)
        b1c = b1.reshape(H, 1).astype(jnp.float32)
        b2c = b2.reshape(C, 1).astype(jnp.float32)

        out2 = pl.pallas_call(
            functools.partial(_fused_kernel, inv_l=1.0 / L, tb=tb, C=C),
            out_shape=jax.ShapeDtypeStruct((R, L), x.dtype),
            grid=(nb,),
            in_specs=[
                pl.BlockSpec((tbc, L), lambda b: (b, 0)),
                pl.BlockSpec((H, C), lambda b: (0, 0)),
                pl.BlockSpec((H, 1), lambda b: (0, 0)),
                pl.BlockSpec((C, H), lambda b: (0, 0)),
                pl.BlockSpec((C, 1), lambda b: (0, 0)),
            ],
            out_specs=pl.BlockSpec((tbc, L), lambda b: (b, 0)),
            input_output_aliases={0: 0} if donate_x else {},
            compiler_params=pltpu.CompilerParams(
                dimension_semantics=("parallel",),
                vmem_limit_bytes=_vmem_limit(4 * blk + fused_extra, cap),
            ),
            cost_estimate=pl.CostEstimate(
                flops=2 * B * C * L + 2 * B * (C * H + H * C),
                transcendentals=B * C,
                bytes_accessed=2 * R * L * itemsize + params_bytes,
            ),
        )(x2, w1t, b1c, w2t, b2c)
        return out2.reshape(B, C, L)

    # ------------- two-pass fallback (slab does not fit VMEM) ----------------
    w1f = w1.astype(jnp.float32)
    w2f = w2.astype(jnp.float32)
    b1r = b1.reshape(1, H).astype(jnp.float32)
    b2r = b2.reshape(1, C).astype(jnp.float32)

    # stage 1: gate s = sigmoid(fc2(relu(fc1(mean_L(x))))), shape (B, C)
    blk_cap_gate = max(1 << 20,
                       (vmem_budget_bytes - params_bytes) * itemsize // (2 * itemsize + 4))
    gate_cands = [d for d in _divisors(B) if d % _SUBLANE == 0 or d == B]
    row_full = C * L * itemsize
    gate_fit = [d for d in gate_cands if d * row_full <= blk_cap_gate]
    if gate_fit:
        tl_gate = L
        good = [d for d in gate_fit if d * row_full >= target]
        tb = min(good) if good else max(gate_fit)
    else:
        tb = min(gate_cands)
        tl_gate = _pick_tile(L, _LANE, max(_LANE, blk_cap_gate // (tb * C * itemsize)))
    nb, nl_gate = B // tb, L // tl_gate
    gate_blk = tb * C * tl_gate * itemsize
    gate_need = 2 * gate_blk + (gate_blk * 4) // itemsize + params_bytes + 3 * tb * C * 4

    s = pl.pallas_call(
        functools.partial(_gate_kernel, inv_l=1.0 / L),
        out_shape=jax.ShapeDtypeStruct((B, C), jnp.float32),
        grid=(nb, nl_gate),
        in_specs=[
            pl.BlockSpec((tb, C, tl_gate), lambda b, l: (b, 0, l)),
            pl.BlockSpec((C, H), lambda b, l: (0, 0)),
            pl.BlockSpec((1, H), lambda b, l: (0, 0)),
            pl.BlockSpec((H, C), lambda b, l: (0, 0)),
            pl.BlockSpec((1, C), lambda b, l: (0, 0)),
        ],
        out_specs=pl.BlockSpec((tb, C), lambda b, l: (b, 0)),
        scratch_shapes=[pltpu.VMEM((tb, C), jnp.float32)],
        compiler_params=pltpu.CompilerParams(
            dimension_semantics=("parallel", "arbitrary"),
            vmem_limit_bytes=_vmem_limit(gate_need, cap),
        ),
        cost_estimate=pl.CostEstimate(
            flops=B * C * L + 2 * B * (C * H + H * C),
            transcendentals=B * C,
            bytes_accessed=B * C * L * itemsize + params_bytes + B * C * 4,
        ),
    )(x, w1f, b1r, w2f, b2r)

    # stage 2: lane-dense channel-wise rescale on the flattened (R, L) view
    s2 = s.reshape(R, 1)
    blk_goal = min(target, max(1 << 20, vmem_budget_bytes // 5))
    tl = _pick_tile(L, _LANE, max(_LANE, blk_goal // (_SUBLANE * itemsize)))
    tr = _pick_tile(R, _SUBLANE, max(_SUBLANE, blk_goal // (tl * itemsize)))
    nr, nl = R // tr, L // tl
    scale_blk = tr * tl * itemsize

    out2 = pl.pallas_call(
        _scale_kernel,
        out_shape=jax.ShapeDtypeStruct((R, L), x.dtype),
        grid=(nr, nl),
        in_specs=[
            pl.BlockSpec((tr, tl), lambda r, l: (r, l)),
            pl.BlockSpec((tr, 1), lambda r, l: (r, 0)),
        ],
        out_specs=pl.BlockSpec((tr, tl), lambda r, l: (r, l)),
        input_output_aliases={0: 0} if donate_x else {},
        compiler_params=pltpu.CompilerParams(
            dimension_semantics=("parallel", "parallel"),
            vmem_limit_bytes=_vmem_limit(4 * scale_blk + scale_blk + 2 * tr * 4, cap),
        ),
        cost_estimate=pl.CostEstimate(
            flops=R * L,
            transcendentals=0,
            bytes_accessed=2 * R * L * itemsize + R * 4,
        ),
    )(x2, s2)
    return out2.reshape(B, C, L)


# ------------------------------ reference -------------------------------------

def se_layer_reference(x, w1, b1, w2, b2):
    y = jnp.mean(x.astype(jnp.float32), axis=-1)
    h = jnp.maximum(y @ w1 + b1, 0.0)
    s = jax.nn.sigmoid(h @ w2 + b2)
    return (x.astype(jnp.float32) * s[:, :, None]).astype(x.dtype)


if __name__ == "__main__":
    key = jax.random.PRNGKey(0)
    B, C, L = 2, 4, 16
    reduction = 1
    H = C // reduction

    k_x, k_w1, k_b1, k_w2, k_b2 = jax.random.split(key, 5)
    x = jax.random.normal(k_x, (B, C, L), dtype=jnp.float32)
    # torch Linear weight is (out, in); we store the transposed (in, out) form.
    w1 = jax.random.normal(k_w1, (C, H), dtype=jnp.float32) * 0.1
    b1 = jax.random.normal(k_b1, (H,), dtype=jnp.float32) * 0.1
    w2 = jax.random.normal(k_w2, (H, C), dtype=jnp.float32) * 0.1
    b2 = jax.random.normal(k_b2, (C,), dtype=jnp.float32) * 0.1

    ref = se_layer_reference(x, w1, b1, w2, b2)

    # preferred fused single-pass path
    out = jax.block_until_ready(se_layer(x, w1, b1, w2, b2))
    assert out.shape == (B, C, L)
    assert jnp.allclose(out, ref, atol=2e-3, rtol=2e-3), float(jnp.max(jnp.abs(out - ref)))

    # also exercise the two-pass fallback path (tiny budget forces it)
    out_fb = jax.block_until_ready(se_layer(x, w1, b1, w2, b2, vmem_budget_bytes=2048))
    assert jnp.allclose(out_fb, ref, atol=2e-3, rtol=2e-3), float(jnp.max(jnp.abs(out_fb - ref)))

    print("KERNEL_OK")
</pallas_src>

<mosaic_0001>
module attributes {stable_mosaic.version = 11 : i64} {
  func.func @_fused_kernel(%arg0: i32, %arg1: memref<8x16xf32, #tpu.memory_space<vmem>>, %arg2: memref<4x4xf32, #tpu.memory_space<vmem>>, %arg3: memref<4x1xf32, #tpu.memory_space<vmem>>, %arg4: memref<4x4xf32, #tpu.memory_space<vmem>>, %arg5: memref<4x1xf32, #tpu.memory_space<vmem>>, %arg6: memref<8x16xf32, #tpu.memory_space<vmem>>) attributes {dimension_semantics = [#tpu.dimension_semantics<parallel>], iteration_bounds = array<i64: 1>, scalar_prefetch = 0 : i64, scratch_operands = 0 : i64, tpu.core_type = #tpu.core_type<tc>, window_params = [{transform_indices = @transform_0, window_bounds = array<i64: 8, 16>}, {pipeline_mode = #tpu.pipeline_mode<synchronous>, transform_indices = @transform_1, window_bounds = array<i64: 4, 4>}, {pipeline_mode = #tpu.pipeline_mode<synchronous>, transform_indices = @transform_2, window_bounds = array<i64: 4, 1>}, {pipeline_mode = #tpu.pipeline_mode<synchronous>, transform_indices = @transform_3, window_bounds = array<i64: 4, 4>}, {pipeline_mode = #tpu.pipeline_mode<synchronous>, transform_indices = @transform_4, window_bounds = array<i64: 4, 1>}, {transform_indices = @transform_5, window_bounds = array<i64: 8, 16>}]} {
    %c0 = arith.constant 0 : index
    %c0_0 = arith.constant 0 : index
    %0 = vector.load %arg1[%c0, %c0_0] : memref<8x16xf32, #tpu.memory_space<vmem>>, vector<4x16xf32>
    %cst = arith.constant dense<0.000000e+00> : vector<4xf32>
    %1 = vector.multi_reduction <add>, %0, %cst [1] : vector<4x16xf32> to vector<4xf32>
    %2 = vector.shape_cast %1 : vector<4xf32> to vector<4x1xf32>
    %cst_1 = arith.constant 6.250000e-02 : f32
    %3 = vector.broadcast %cst_1 : f32 to vector<4x1xf32>
    %4 = arith.mulf %2, %3 : vector<4x1xf32>
    %c0_2 = arith.constant 0 : index
    %c0_3 = arith.constant 0 : index
    %5 = vector.load %arg2[%c0_2, %c0_3] : memref<4x4xf32, #tpu.memory_space<vmem>>, vector<4x4xf32>
    %cst_4 = arith.constant dense<0.000000e+00> : vector<4x1xf32>
    %6 = tpu.matmul %5, %4, %cst_4 {dimension_numbers = #tpu.dot_dimension_numbers<[1], [0], [0], [1], [0, 0, 1, 1], [], []>} : vector<4x4xf32>, vector<4x1xf32>, vector<4x1xf32> -> vector<4x1xf32>
    %c0_5 = arith.constant 0 : index
    %c0_6 = arith.constant 0 : index
    %7 = vector.load %arg3[%c0_5, %c0_6] : memref<4x1xf32, #tpu.memory_space<vmem>>, vector<4x1xf32>
    %8 = arith.addf %6, %7 : vector<4x1xf32>
    %cst_7 = arith.constant 0.000000e+00 : f32
    %9 = vector.broadcast %cst_7 : f32 to vector<4x1xf32>
    %10 = arith.maximumf %8, %9 : vector<4x1xf32>
    %c0_8 = arith.constant 0 : index
    %c0_9 = arith.constant 0 : index
    %11 = vector.load %arg4[%c0_8, %c0_9] : memref<4x4xf32, #tpu.memory_space<vmem>>, vector<4x4xf32>
    %cst_10 = arith.constant dense<0.000000e+00> : vector<4x1xf32>
    %12 = tpu.matmul %11, %10, %cst_10 {dimension_numbers = #tpu.dot_dimension_numbers<[1], [0], [0], [1], [0, 0, 1, 1], [], []>} : vector<4x4xf32>, vector<4x1xf32>, vector<4x1xf32> -> vector<4x1xf32>
    %c0_11 = arith.constant 0 : index
    %c0_12 = arith.constant 0 : index
    %13 = vector.load %arg5[%c0_11, %c0_12] : memref<4x1xf32, #tpu.memory_space<vmem>>, vector<4x1xf32>
    %14 = arith.addf %12, %13 : vector<4x1xf32>
    %cst_13 = arith.constant 0.000000e+00 : f32
    %15 = vector.broadcast %cst_13 : f32 to vector<4x1xf32>
    %16 = arith.subf %15, %14 : vector<4x1xf32>
    %17 = math.exp %16 : vector<4x1xf32>
    %cst_14 = arith.constant 1.000000e+00 : f32
    %18 = vector.broadcast %cst_14 : f32 to vector<4x1xf32>
    %19 = arith.addf %18, %17 : vector<4x1xf32>
    %cst_15 = arith.constant 1.000000e+00 : f32
    %20 = vector.broadcast %cst_15 : f32 to vector<4x1xf32>
    %21 = arith.divf %20, %19 : vector<4x1xf32>
    %22 = vector.broadcast %21 : vector<4x1xf32> to vector<4x16xf32>
    %23 = arith.mulf %0, %22 : vector<4x16xf32>
    %c0_16 = arith.constant 0 : index
    %c0_17 = arith.constant 0 : index
    %24 = vector.load %arg6[%c0_16, %c0_17] : memref<8x16xf32, #tpu.memory_space<vmem>>, vector<4x16xf32>
    tpu.vector_store %arg6[%c0_16, %c0_17], %23 {strides = array<i32>} : memref<8x16xf32, #tpu.memory_space<vmem>>, vector<4x16xf32>,
    %c4 = arith.constant 4 : index
    %c0_18 = arith.constant 0 : index
    %25 = vector.load %arg1[%c4, %c0_18] : memref<8x16xf32, #tpu.memory_space<vmem>>, vector<4x16xf32>
    %cst_19 = arith.constant dense<0.000000e+00> : vector<4xf32>
    %26 = vector.multi_reduction <add>, %25, %cst_19 [1] : vector<4x16xf32> to vector<4xf32>
    %27 = vector.shape_cast %26 : vector<4xf32> to vector<4x1xf32>
    %cst_20 = arith.constant 6.250000e-02 : f32
    %28 = vector.broadcast %cst_20 : f32 to vector<4x1xf32>
    %29 = arith.mulf %27, %28 : vector<4x1xf32>
    %c0_21 = arith.constant 0 : index
    %c0_22 = arith.constant 0 : index
    %30 = vector.load %arg2[%c0_21, %c0_22] : memref<4x4xf32, #tpu.memory_space<vmem>>, vector<4x4xf32>
    %cst_23 = arith.constant dense<0.000000e+00> : vector<4x1xf32>
    %31 = tpu.matmul %30, %29, %cst_23 {dimension_numbers = #tpu.dot_dimension_numbers<[1], [0], [0], [1], [0, 0, 1, 1], [], []>} : vector<4x4xf32>, vector<4x1xf32>, vector<4x1xf32> -> vector<4x1xf32>
    %c0_24 = arith.constant 0 : index
    %c0_25 = arith.constant 0 : index
    %32 = vector.load %arg3[%c0_24, %c0_25] : memref<4x1xf32, #tpu.memory_space<vmem>>, vector<4x1xf32>
    %33 = arith.addf %31, %32 : vector<4x1xf32>
    %cst_26 = arith.constant 0.000000e+00 : f32
    %34 = vector.broadcast %cst_26 : f32 to vector<4x1xf32>
    %35 = arith.maximumf %33, %34 : vector<4x1xf32>
    %c0_27 = arith.constant 0 : index
    %c0_28 = arith.constant 0 : index
    %36 = vector.load %arg4[%c0_27, %c0_28] : memref<4x4xf32, #tpu.memory_space<vmem>>, vector<4x4xf32>
    %cst_29 = arith.constant dense<0.000000e+00> : vector<4x1xf32>
    %37 = tpu.matmul %36, %35, %cst_29 {dimension_numbers = #tpu.dot_dimension_numbers<[1], [0], [0], [1], [0, 0, 1, 1], [], []>} : vector<4x4xf32>, vector<4x1xf32>, vector<4x1xf32> -> vector<4x1xf32>
    %c0_30 = arith.constant 0 : index
    %c0_31 = arith.constant 0 : index
    %38 = vector.load %arg5[%c0_30, %c0_31] : memref<4x1xf32, #tpu.memory_space<vmem>>, vector<4x1xf32>
    %39 = arith.addf %37, %38 : vector<4x1xf32>
    %cst_32 = arith.constant 0.000000e+00 : f32
    %40 = vector.broadcast %cst_32 : f32 to vector<4x1xf32>
    %41 = arith.subf %40, %39 : vector<4x1xf32>
    %42 = math.exp %41 : vector<4x1xf32>
    %cst_33 = arith.constant 1.000000e+00 : f32
    %43 = vector.broadcast %cst_33 : f32 to vector<4x1xf32>
    %44 = arith.addf %43, %42 : vector<4x1xf32>
    %cst_34 = arith.constant 1.000000e+00 : f32
    %45 = vector.broadcast %cst_34 : f32 to vector<4x1xf32>
    %46 = arith.divf %45, %44 : vector<4x1xf32>
    %47 = vector.broadcast %46 : vector<4x1xf32> to vector<4x16xf32>
    %48 = arith.mulf %25, %47 : vector<4x16xf32>
    %c4_35 = arith.constant 4 : index
    %c0_36 = arith.constant 0 : index
    %49 = vector.load %arg6[%c4_35, %c0_36] : memref<8x16xf32, #tpu.memory_space<vmem>>, vector<4x16xf32>
    tpu.vector_store %arg6[%c4_35, %c0_36], %48 {strides = array<i32>} : memref<8x16xf32, #tpu.memory_space<vmem>>, vector<4x16xf32>,
    return
  }
  func.func @transform_0(%arg0: i32) -> (i32, i32) {
    %c0_i32 = arith.constant 0 : i32
    %c0_i32_0 = arith.constant 0 : i32
    return %arg0, %c0_i32 : i32, i32
  }
  func.func @transform_1(%arg0: i32) -> (i32, i32) {
    %c0_i32 = arith.constant 0 : i32
    %c0_i32_0 = arith.constant 0 : i32
    %c0_i32_1 = arith.constant 0 : i32
    return %c0_i32, %c0_i32_0 : i32, i32
  }
  func.func @transform_2(%arg0: i32) -> (i32, i32) {
    %c0_i32 = arith.constant 0 : i32
    %c0_i32_0 = arith.constant 0 : i32
    %c0_i32_1 = arith.constant 0 : i32
    return %c0_i32, %c0_i32_0 : i32, i32
  }
  func.func @transform_3(%arg0: i32) -> (i32, i32) {
    %c0_i32 = arith.constant 0 : i32
    %c0_i32_0 = arith.constant 0 : i32
    %c0_i32_1 = arith.constant 0 : i32
    return %c0_i32, %c0_i32_0 : i32, i32
  }
  func.func @transform_4(%arg0: i32) -> (i32, i32) {
    %c0_i32 = arith.constant 0 : i32
    %c0_i32_0 = arith.constant 0 : i32
    %c0_i32_1 = arith.constant 0 : i32
    return %c0_i32, %c0_i32_0 : i32, i32
  }
  func.func @transform_5(%arg0: i32) -> (i32, i32) {
    %c0_i32 = arith.constant 0 : i32
    %c0_i32_0 = arith.constant 0 : i32
    return %arg0, %c0_i32 : i32, i32
  }
}

</mosaic_0001>

<bundles_post_ra>
// kernel: tpu_custom_call.1
= control target key start
LH: loop header
LB: loop body
LE: loop exit
PB: predicated region body
PF: predicated region fallthrough
CT: control target
= control target key end

     0   :  { %10 = vsyncpa [#allocation3], 0  ;;  %s387_s0 = inlined_call_operand.vmem [shape: f32[8,16], index: 0, kind: input, shape index: {}]   ;;  %s388_s1 = inlined_call_operand.hbm [shape: f32[4,4], index: 1, kind: input, shape index: {}]   ;;  %s389_s2 = inlined_call_operand.vmem [shape: f32[4,1], index: 2, kind: input, shape index: {}]   ;;  %s390_s3 = inlined_call_operand.vmem [shape: f32[4,4], index: 3, kind: input, shape index: {}]   ;;  %s391_s4 = inlined_call_operand.vmem [shape: f32[4,1], index: 4, kind: input, shape index: {}]   ;;  %s392_s5 = inlined_call_operand.hbm [shape: f32[8,16], index: 5, kind: output, shape index: {}]  }
   0x1   :  { %11 = vsyncpa [#allocation4], 0  ;;  %s19_s20 = sshll.u32 %s388_s1, 4  ;;  %s304_s21 = smov [#allocation2]   ;;  %s20_s20 = int_to_ptr.hbm [resolvable:$true] %s19_s20 }
   0x2   :  { %s21_s22 = sshll.u32 %s304_s21, 4  ;;  %s22_s22 = int_to_ptr.vmem [resolvable:$true] %s21_s22 }
   0x3   :  { %24 = dma.hbm_to_vmem [thread:$0]  %s20_s20, 64, %s22_s22, [#allocation3]  }
   0x4   :  { %300 = dma.done.wait [#allocation3], 64  }
   0x5   :  { %301 = vsyncadd [#allocation3], 4294967232  ;;  %vm36_vm0 = vcmask 125952   ;;  %v343_v0 = vld [vmem:[%s387_s0 + $0x4] sm:$0xf]  ;;  %vm47_vm1 = vcmask 1043456  }
   0x6   :  { %v127_v1 = vsel %vm36_vm0, %v343_v0, 0.0  ;;  %v350_v2 = vld [vmem:[%s387_s0] sm:$0xf]  ;;  %vm43_vm2 = vcmask 31744   ;;  %v305_v20 = vmov 0   ;;  %s221_s13 = sshll.u32 %s392_s5, 4  ;;  %s222_s13 = int_to_ptr.hbm [resolvable:$true] %s221_s13 }
   0x7   :  { %128 = vadd.xlane.f32.xlu0 %v127_v1  ;;  %v37_v3 = vsel %vm36_vm0, %v350_v2, 0.0  ;;  %v131_v6 = vld [vmem:[#allocation2] sm:$0xf]  ;;  %242 = vset.pattern.permute.xlu1 %v305_v20 }
   0x8   :  { %v41_v9 = vld [vmem:[#allocation2] sm:$0xf]  ;;  %243 = vset.pattern.permute.xlu0 %v305_v20 }
   0x9   :  { %v132_v10 = vld [vmem:[%s389_s2] sm:$0xf] }
   0xa   :  { %v42_v12 = vld [vmem:[%s389_s2] sm:$0xf] }
   0xb   :  { %v160_v17 = vld [vmem:[%s390_s3] sm:$0xf] }
   0xc   :  { %v72_v19 = vld [vmem:[%s390_s3] sm:$0xf]  ;;  %s306_s3 = smov [#allocation5]  }
   0xd   :  { %v73_v21 = vld [vmem:[%s391_s4] sm:$0xf] }
   0xe   :  { %v161_v24 = vld [vmem:[%s391_s4] sm:$0xf]  ;;  %s219_s4 = sshll.u32 %s306_s3, 4  ;;  %s220_s4 = int_to_ptr.vmem [resolvable:$true] %s219_s4 }
   0xf   :  { %38 = vadd.xlane.f32.xlu0 %v37_v3 }
  0x7a   :  { %v129_v4 = vpop.xlane.xlu0 %128 }
  0x7b   :  { %v130_v5 = vmul.f32 0.0625, %v129_v4 }
  0x7d   :  { %235 = vmatpush.msk.msra.mxu2 %vm47_vm1, %v130_v5 }
  0x7e   :  { %236 = vmatmul.msk.f32.vlgmr.msra.gmra.mxu2 %vm43_vm2, %v131_v6 }
  0x82   :  { %v39_v7 = vpop.xlane.xlu0 %38 }
  0x83   :  { %v40_v8 = vmul.f32 0.0625, %v39_v7 }
  0x85   :  { %231 = vmatpush.msk.msra.mxu0 %vm47_vm1, %v40_v8 }
  0x86   :  { %232 = vmatmul.msk.f32.vlgmr.msra.gmra.mxu0 %vm43_vm2, %v41_v9 }
 0x101   :  { %v156_v11 = vpop.f32.mrf.mxu2 }
 0x102   :  { %v157_v13 = vadd.f32 %v156_v11, %v132_v10 }
 0x103   :  { %v68_v14 = vpop.f32.mrf.mxu0 }
 0x104   :  { %v159_v15 = vmax.f32 %v157_v13, 0.0  ;;  %v69_v16 = vadd.f32 %v68_v14, %v42_v12 }
 0x106   :  { %v71_v18 = vmax.f32 %v69_v16, 0.0  ;;  %237 = vmatpush.msk.msra.mxu3 %vm47_vm1, %v159_v15 }
 0x107   :  { %238 = vmatmul.msk.f32.vlgmr.msra.gmra.mxu3 %vm43_vm2, %v160_v17 }
 0x108   :  { %233 = vmatpush.msk.msra.mxu1 %vm47_vm1, %v71_v18 }
 0x109   :  { %234 = vmatmul.msk.f32.vlgmr.msra.gmra.mxu1 %vm43_vm2, %v72_v19 }
 0x186   :  { %v97_v22 = vpop.f32.mrf.mxu1 }
 0x187   :  { %v98_v23 = vadd.f32 %v97_v22, %v73_v21 }
 0x189   :  { %v100_v25 = vsub.f32 0.0, %v98_v23 }
 0x18a   :  { %v185_v26 = vpop.f32.mrf.mxu3 }
 0x18b   :  { %v101_v27 = vmul.f32 1.442695, %v100_v25  ;;  %v186_v28 = vadd.f32 %v185_v26, %v161_v24 }
 0x18d   :  { %244 = vpow2.f32 %v101_v27  ;;  %v188_v29 = vsub.f32 0.0, %v186_v28 }
 0x18f   :  { %v189_v30 = vmul.f32 1.442695, %v188_v29 }
 0x191   :  { %246 = vpow2.f32 %v189_v30 }
 0x193   :  { %v245_v31 = vpop.eup %244 }
 0x194   :  { %v103_v32 = vadd.f32 1.0, %v245_v31 }
 0x196   :  { %248 = vrcp.f32 %v103_v32  ;;  %v115_v39 = vand.u32 2147483648, %v103_v32  ;;  %v113_v41 = vand.u32 2147483647, %v103_v32  ;;  %vm109_vm4 = vweird.f32 %v103_v32 }
 0x197   :  { %v247_v33 = vpop.eup %246 }
 0x198   :  { %v191_v34 = vadd.f32 1.0, %v247_v33  ;;  %v116_v45 = vor.u32 1.1754944e-38, %v115_v39  ;;  %vm114_vm6 = vcmp.eq.f32.partialorder %v113_v41, 8.507059e+37 }
 0x19a   :  { %250 = vrcp.f32 %v191_v34  ;;  %v203_v50 = vand.u32 2147483648, %v191_v34  ;;  %vm197_vm8 = vweird.f32 %v191_v34  ;;  %v201_v51 = vand.u32 2147483647, %v191_v34 }
 0x19c   :  { %v249_v35 = vpop.eup %248  ;;  %v204_v53 = vor.u32 1.1754944e-38, %v203_v50  ;;  %vm202_vm10 = vcmp.eq.f32.partialorder %v201_v51, 8.507059e+37 }
 0x19d   :  { %v105_v36 = vmul.f32 %v249_v35, %v103_v32  ;;  %vm110_vm3 = vweird.f32 %v249_v35 }
 0x19e   :  { %vm111_vm5 = vmor %vm109_vm4, %vm110_vm3 }
 0x19f   :  { %v106_v37 = vsub.f32 1.0, %v105_v36 }
 0x1a0   :  { %v251_v38 = vpop.eup %250 }
 0x1a1   :  { %v107_v40 = vmul.f32 %v249_v35, %v106_v37  ;;  %v193_v42 = vmul.f32 %v251_v38, %v191_v34  ;;  %vm198_vm7 = vweird.f32 %v251_v38 }
 0x1a2   :  { %vm199_vm9 = vmor %vm197_vm8, %vm198_vm7 }
 0x1a3   :  { %v108_v43 = vadd.f32 %v249_v35, %v107_v40  ;;  %v194_v44 = vsub.f32 1.0, %v193_v42 }
 0x1a5   :  { %v112_v46 = vsel %vm111_vm5, %v249_v35, %v108_v43  ;;  %v195_v47 = vmul.f32 %v251_v38, %v194_v44 }
 0x1a6   :  { %v117_v48 = vsel %vm114_vm6, %v116_v45, %v112_v46 }
 0x1a7   :  { %121 = vperm.xlu1 %242, %v117_v48   ;;  %v196_v49 = vadd.f32 %v251_v38, %v195_v47 }
 0x1a9   :  { %v200_v52 = vsel %vm199_vm9, %v251_v38, %v196_v49 }
 0x1aa   :  { %v205_v54 = vsel %vm202_vm10, %v204_v53, %v200_v52 }
 0x1af   :  { %209 = vperm.xlu1 %242, %v205_v54  }
 0x219   :  { %v122_v55 = vpop.permute.xlu1 %121 }
 0x21a   :  { %v124_v56 = vmul.f32 %v122_v55, %v350_v2 }
 0x21c   :  { %125 = vst.msk [vmem:[#allocation5] sm:$0xf] %vm36_vm0, %v124_v56 }
 0x221   :  { %v210_v57 = vpop.permute.xlu1 %209 }
 0x222   :  { %v212_v58 = vmul.f32 %v210_v57, %v343_v0 }
 0x224   :  { %213 = vst.msk [vmem:[#allocation5 + $0x4] sm:$0xf] %vm36_vm0, %v212_v58 }
 0x225   :  { %224 = dma.vmem_to_hbm [thread:$0]  %s220_s4, 128, %s222_s13, [#allocation4]  }
 0x226   :  { %302 = dma.done.wait [#allocation4], 128  }
 0x227   :  { %303 = vsyncadd [#allocation4], 4294967168 }
 0x228   :  { %229 = vsyncpa [#allocation3], 1 }
 0x229   :  { %230 = vsyncpa [#allocation4], 1 }

</bundles_post_ra>
